<compile_context>
chip_gen: v7x
topology: tpu7x:2x2x1
jax: 0.10.0
libtpu: 0.0.40
codegen_flags: <defaults>
</compile_context>

<pallas_src>
import jax
import jax.numpy as jnp
from jax.experimental import pallas as pl
from jax.experimental.pallas import tpu as pltpu

OUT_PAD = 8        # final layer padded 3 -> 8 columns (minimum legal block width)
MAX_TILE_B = 2048  # cap on the batch tile (multiple of 256)


def _pick_tile_b(batch):
    """Static (trace-time) batch-tile selection."""
    b8 = ((batch + 7) // 8) * 8            # sublane-align
    if b8 <= 512:
        return b8                           # tiny batch: one small tile, overhead moot
    half = (b8 + 1) // 2                    # guarantee >= 2 grid steps (v7x megacore)
    tile = ((half + 255) // 256) * 256      # multiple of 256 -> full MXU M utilization
    return min(MAX_TILE_B, tile)


def _directnet_kernel(x_ref, w1_ref, b1_ref, w2_ref, b2_ref, w3_ref, b3_ref, o_ref):
    # x_ref: (TILE_B, 7) f32; w1 f32; w2/w3 bf16; biases f32; o_ref: (TILE_B, 8) f32.
    x = x_ref[...]                                                    # f32, K = 7
    h1 = jnp.dot(x, w1_ref[...], preferred_element_type=jnp.float32) + b1_ref[...]
    h1 = jnp.maximum(h1, 0.0).astype(jnp.bfloat16)

    h2 = jnp.dot(h1, w2_ref[...], preferred_element_type=jnp.float32) + b2_ref[...]
    h2 = jnp.maximum(h2, 0.0).astype(jnp.bfloat16)

    o_ref[...] = jnp.dot(h2, w3_ref[...], preferred_element_type=jnp.float32) + b3_ref[...]


def prepare_params(params):
    """One-time weight cast/pad, hoisted out of the per-call hot path."""
    w1, b1, w2, b2, w3, b3 = params  # (7,128),(1,128),(128,128),(1,128),(128,3),(1,3)
    w1f = w1.astype(jnp.float32)                        # layer-1 stays f32 (K=7, cheap)
    b1f = b1.reshape(1, -1).astype(jnp.float32)
    w2b = w2.astype(jnp.bfloat16)
    b2f = b2.reshape(1, -1).astype(jnp.float32)
    w3p = jnp.zeros((128, OUT_PAD), jnp.bfloat16).at[:, :3].set(w3.astype(jnp.bfloat16))
    b3p = jnp.zeros((1, OUT_PAD), jnp.float32).at[:, :3].set(
        b3.reshape(1, -1).astype(jnp.float32))
    return (w1f, b1f, w2b, b2f, w3p, b3p)


def directnet_forward(x, prepared):
    """x: (B, 7) float32 -> (B, 3) float32."""
    w1f, b1f, w2b, b2f, w3p, b3p = prepared
    B = x.shape[0]
    tile_b = _pick_tile_b(B)
    n_tiles = pl.cdiv(B, tile_b)

    flops = 2 * B * (7 * 128 + 128 * 128 + 128 * OUT_PAD)
    bytes_accessed = (B * 7 * 4 + B * OUT_PAD * 4
                      + 7 * 128 * 4 + 128 * 128 * 2 + 128 * OUT_PAD * 2
                      + (128 + 128 + OUT_PAD) * 4)

    out = pl.pallas_call(
        _directnet_kernel,
        out_shape=jax.ShapeDtypeStruct((B, OUT_PAD), jnp.float32),
        grid=(n_tiles,),
        in_specs=[
            pl.BlockSpec((tile_b, 7), lambda i: (i, 0)),       # x tile, pipelined
            pl.BlockSpec((7, 128), lambda i: (0, 0)),          # w1, VMEM-resident
            pl.BlockSpec((1, 128), lambda i: (0, 0)),          # b1
            pl.BlockSpec((128, 128), lambda i: (0, 0)),        # w2
            pl.BlockSpec((1, 128), lambda i: (0, 0)),          # b2
            pl.BlockSpec((128, OUT_PAD), lambda i: (0, 0)),    # w3 (3 -> 8 cols)
            pl.BlockSpec((1, OUT_PAD), lambda i: (0, 0)),      # b3 (3 -> 8 cols)
        ],
        out_specs=pl.BlockSpec((tile_b, OUT_PAD), lambda i: (i, 0)),
        compiler_params=pltpu.CompilerParams(
            dimension_semantics=("parallel",),                  # megacore on v7x
        ),
        cost_estimate=pl.CostEstimate(
            flops=flops, transcendentals=0, bytes_accessed=bytes_accessed),
    )(x.astype(jnp.float32), w1f, b1f, w2b, b2f, w3p, b3p)

    return out[:, :3]


def init_params(key):
    """PyTorch Linear-style init (uniform +/- 1/sqrt(fan_in)); weights stored
    (in_features, out_features) so the kernel computes x @ W + b."""
    dims = [(7, 128), (128, 128), (128, 3)]
    params = []
    for fan_in, fan_out in dims:
        key, kw, kb = jax.random.split(key, 3)
        bound = 1.0 / jnp.sqrt(float(fan_in))
        w = jax.random.uniform(kw, (fan_in, fan_out), jnp.float32, -bound, bound)
        b = jax.random.uniform(kb, (1, fan_out), jnp.float32, -bound, bound)
        params += [w, b]
    return params


def directnet_ref_f32(x, params):
    w1, b1, w2, b2, w3, b3 = params
    h1 = jnp.maximum(x @ w1 + b1, 0.0)
    h2 = jnp.maximum(h1 @ w2 + b2, 0.0)
    return h2 @ w3 + b3


def directnet_ref_mixed(x, params):
    # Mirrors the kernel numerics: f32 layer 1, bf16-input / f32-accum layers 2 and 3.
    w1, b1, w2, b2, w3, b3 = params
    bf = jnp.bfloat16
    h1 = jnp.maximum(
        jnp.dot(x, w1, preferred_element_type=jnp.float32,
                precision=jax.lax.Precision.HIGHEST) + b1, 0.0)
    h2 = jnp.maximum(
        jnp.dot(h1.astype(bf), w2.astype(bf), preferred_element_type=jnp.float32) + b2,
        0.0)
    return jnp.dot(h2.astype(bf), w3.astype(bf), preferred_element_type=jnp.float32) + b3


if __name__ == "__main__":
    key = jax.random.PRNGKey(0)
    k_x, k_p = jax.random.split(key)

    B = 8  # small batch example
    x = jax.random.normal(k_x, (B, 7), jnp.float32)
    params = init_params(k_p)
    prepared = prepare_params(params)

    out = directnet_forward(x, prepared)
    out = jax.block_until_ready(out)
    assert out.shape == (B, 3), out.shape

    # Check against a reference that mirrors the kernel's mixed-precision math.
    ref_mixed = directnet_ref_mixed(x, params)
    assert jnp.allclose(out, ref_mixed, atol=2e-2, rtol=2e-2), (
        f"mixed-ref max abs err = {jnp.max(jnp.abs(out - ref_mixed))}"
    )

    # Looser check against the full-f32 PyTorch-equivalent forward.
    ref_f32 = directnet_ref_f32(x, params)
    assert jnp.allclose(out, ref_f32, atol=5e-2, rtol=5e-2), (
        f"f32-ref max abs err = {jnp.max(jnp.abs(out - ref_f32))}"
    )

    print("KERNEL_OK")
</pallas_src>

<mosaic_0001>
module attributes {stable_mosaic.version = 11 : i64} {
  func.func @_directnet_kernel(%arg0: i32, %arg1: memref<8x7xf32, #tpu.memory_space<vmem>>, %arg2: memref<7x128xf32, #tpu.memory_space<vmem>>, %arg3: memref<1x128xf32, #tpu.memory_space<vmem>>, %arg4: memref<128x128xbf16, #tpu.memory_space<vmem>>, %arg5: memref<1x128xf32, #tpu.memory_space<vmem>>, %arg6: memref<128x8xbf16, #tpu.memory_space<vmem>>, %arg7: memref<1x8xf32, #tpu.memory_space<vmem>>, %arg8: memref<8x8xf32, #tpu.memory_space<vmem>>) attributes {dimension_semantics = [#tpu.dimension_semantics<parallel>], iteration_bounds = array<i64: 1>, scalar_prefetch = 0 : i64, scratch_operands = 0 : i64, tpu.core_type = #tpu.core_type<tc>, window_params = [{transform_indices = @transform_0, window_bounds = array<i64: 8, 7>}, {pipeline_mode = #tpu.pipeline_mode<synchronous>, transform_indices = @transform_1, window_bounds = array<i64: 7, 128>}, {pipeline_mode = #tpu.pipeline_mode<synchronous>, transform_indices = @transform_2, window_bounds = array<i64: 1, 128>}, {pipeline_mode = #tpu.pipeline_mode<synchronous>, transform_indices = @transform_3, window_bounds = array<i64: 128, 128>}, {pipeline_mode = #tpu.pipeline_mode<synchronous>, transform_indices = @transform_4, window_bounds = array<i64: 1, 128>}, {pipeline_mode = #tpu.pipeline_mode<synchronous>, transform_indices = @transform_5, window_bounds = array<i64: 128, 8>}, {pipeline_mode = #tpu.pipeline_mode<synchronous>, transform_indices = @transform_6, window_bounds = array<i64: 1, 8>}, {transform_indices = @transform_7, window_bounds = array<i64: 8, 8>}]} {
    %c0 = arith.constant 0 : index
    %c0_0 = arith.constant 0 : index
    %0 = vector.load %arg1[%c0, %c0_0] : memref<8x7xf32, #tpu.memory_space<vmem>>, vector<8x7xf32>
    %c0_1 = arith.constant 0 : index
    %c0_2 = arith.constant 0 : index
    %1 = vector.load %arg2[%c0_1, %c0_2] : memref<7x128xf32, #tpu.memory_space<vmem>>, vector<7x128xf32>
    %cst = arith.constant dense<0.000000e+00> : vector<8x128xf32>
    %2 = tpu.matmul %0, %1, %cst {dimension_numbers = #tpu.dot_dimension_numbers<[1], [0], [0], [1], [0, 0, 1, 1], [], []>} : vector<8x7xf32>, vector<7x128xf32>, vector<8x128xf32> -> vector<8x128xf32>
    %c0_3 = arith.constant 0 : index
    %c0_4 = arith.constant 0 : index
    %3 = vector.load %arg3[%c0_3, %c0_4] : memref<1x128xf32, #tpu.memory_space<vmem>>, vector<1x128xf32>
    %4 = vector.broadcast %3 : vector<1x128xf32> to vector<8x128xf32>
    %5 = arith.addf %2, %4 : vector<8x128xf32>
    %cst_5 = arith.constant 0.000000e+00 : f32
    %6 = vector.broadcast %cst_5 : f32 to vector<8x128xf32>
    %7 = arith.maximumf %5, %6 : vector<8x128xf32>
    %8 = arith.truncf %7 : vector<8x128xf32> to vector<8x128xbf16>
    %c0_6 = arith.constant 0 : index
    %c0_7 = arith.constant 0 : index
    %9 = vector.load %arg4[%c0_6, %c0_7] : memref<128x128xbf16, #tpu.memory_space<vmem>>, vector<128x128xbf16>
    %cst_8 = arith.constant dense<0.000000e+00> : vector<8x128xf32>
    %10 = tpu.matmul %8, %9, %cst_8 {dimension_numbers = #tpu.dot_dimension_numbers<[1], [0], [0], [1], [0, 0, 1, 1], [], []>} : vector<8x128xbf16>, vector<128x128xbf16>, vector<8x128xf32> -> vector<8x128xf32>
    %c0_9 = arith.constant 0 : index
    %c0_10 = arith.constant 0 : index
    %11 = vector.load %arg5[%c0_9, %c0_10] : memref<1x128xf32, #tpu.memory_space<vmem>>, vector<1x128xf32>
    %12 = vector.broadcast %11 : vector<1x128xf32> to vector<8x128xf32>
    %13 = arith.addf %10, %12 : vector<8x128xf32>
    %cst_11 = arith.constant 0.000000e+00 : f32
    %14 = vector.broadcast %cst_11 : f32 to vector<8x128xf32>
    %15 = arith.maximumf %13, %14 : vector<8x128xf32>
    %16 = arith.truncf %15 : vector<8x128xf32> to vector<8x128xbf16>
    %c0_12 = arith.constant 0 : index
    %c0_13 = arith.constant 0 : index
    %17 = vector.load %arg6[%c0_12, %c0_13] : memref<128x8xbf16, #tpu.memory_space<vmem>>, vector<128x8xbf16>
    %cst_14 = arith.constant dense<0.000000e+00> : vector<8x8xf32>
    %18 = tpu.matmul %16, %17, %cst_14 {dimension_numbers = #tpu.dot_dimension_numbers<[1], [0], [0], [1], [0, 0, 1, 1], [], []>} : vector<8x128xbf16>, vector<128x8xbf16>, vector<8x8xf32> -> vector<8x8xf32>
    %c0_15 = arith.constant 0 : index
    %c0_16 = arith.constant 0 : index
    %19 = vector.load %arg7[%c0_15, %c0_16] : memref<1x8xf32, #tpu.memory_space<vmem>>, vector<1x8xf32>
    %20 = vector.broadcast %19 : vector<1x8xf32> to vector<8x8xf32>
    %21 = arith.addf %18, %20 : vector<8x8xf32>
    %c0_17 = arith.constant 0 : index
    %c0_18 = arith.constant 0 : index
    %22 = vector.load %arg8[%c0_17, %c0_18] : memref<8x8xf32, #tpu.memory_space<vmem>>, vector<8x8xf32>
    tpu.vector_store %arg8[%c0_17, %c0_18], %21 {strides = array<i32>} : memref<8x8xf32, #tpu.memory_space<vmem>>, vector<8x8xf32>,
    return
  }
  func.func @transform_0(%arg0: i32) -> (i32, i32) {
    %c0_i32 = arith.constant 0 : i32
    %c0_i32_0 = arith.constant 0 : i32
    return %arg0, %c0_i32 : i32, i32
  }
  func.func @transform_1(%arg0: i32) -> (i32, i32) {
    %c0_i32 = arith.constant 0 : i32
    %c0_i32_0 = arith.constant 0 : i32
    %c0_i32_1 = arith.constant 0 : i32
    return %c0_i32, %c0_i32_0 : i32, i32
  }
  func.func @transform_2(%arg0: i32) -> (i32, i32) {
    %c0_i32 = arith.constant 0 : i32
    %c0_i32_0 = arith.constant 0 : i32
    %c0_i32_1 = arith.constant 0 : i32
    return %c0_i32, %c0_i32_0 : i32, i32
  }
  func.func @transform_3(%arg0: i32) -> (i32, i32) {
    %c0_i32 = arith.constant 0 : i32
    %c0_i32_0 = arith.constant 0 : i32
    %c0_i32_1 = arith.constant 0 : i32
    return %c0_i32, %c0_i32_0 : i32, i32
  }
  func.func @transform_4(%arg0: i32) -> (i32, i32) {
    %c0_i32 = arith.constant 0 : i32
    %c0_i32_0 = arith.constant 0 : i32
    %c0_i32_1 = arith.constant 0 : i32
    return %c0_i32, %c0_i32_0 : i32, i32
  }
  func.func @transform_5(%arg0: i32) -> (i32, i32) {
    %c0_i32 = arith.constant 0 : i32
    %c0_i32_0 = arith.constant 0 : i32
    %c0_i32_1 = arith.constant 0 : i32
    return %c0_i32, %c0_i32_0 : i32, i32
  }
  func.func @transform_6(%arg0: i32) -> (i32, i32) {
    %c0_i32 = arith.constant 0 : i32
    %c0_i32_0 = arith.constant 0 : i32
    %c0_i32_1 = arith.constant 0 : i32
    return %c0_i32, %c0_i32_0 : i32, i32
  }
  func.func @transform_7(%arg0: i32) -> (i32, i32) {
    %c0_i32 = arith.constant 0 : i32
    %c0_i32_0 = arith.constant 0 : i32
    return %arg0, %c0_i32 : i32, i32
  }
}

</mosaic_0001>

<bundles_post_ra>
// kernel: tpu_custom_call.1
= control target key start
LH: loop header
LB: loop body
LE: loop exit
PB: predicated region body
PF: predicated region fallthrough
CT: control target
= control target key end

     0   :  { %12 = vsyncpa [#allocation3], 0  ;;  %s672_s0 = inlined_call_operand.vmem [shape: f32[8,7], index: 0, kind: input, shape index: {}]   ;;  %s673_s1 = inlined_call_operand.hbm [shape: f32[7,128], index: 1, kind: input, shape index: {}]   ;;  %s674_s2 = inlined_call_operand.vmem [shape: f32[1,128], index: 2, kind: input, shape index: {}]   ;;  %s675_s3 = inlined_call_operand.vmem [shape: bf16[128,128], index: 3, kind: input, shape index: {}]   ;;  %s676_s4 = inlined_call_operand.vmem [shape: f32[1,128], index: 4, kind: input, shape index: {}]   ;;  %s677_s5 = inlined_call_operand.vmem [shape: bf16[128,8], index: 5, kind: input, shape index: {}]   ;;  %s678_s6 = inlined_call_operand.vmem [shape: f32[1,8], index: 6, kind: input, shape index: {}]   ;;  %s679_s7 = inlined_call_operand.hbm [shape: f32[8,8], index: 7, kind: output, shape index: {}]  }
   0x1   :  { %13 = vsyncpa [#allocation4], 0  ;;  %s524_s24 = smov [#allocation2]   ;;  %s476_s28 = scalar_lea.hbm %s673_s1, 128 }
   0x2   :  { %s22_s25 = sshll.u32 %s524_s24, 4  ;;  %p477_p0 = scmp.ne.s32.totalorder %s673_s1, %s476_s28  ;;  %s23_s25 = int_to_ptr.vmem [resolvable:$true] %s22_s25 }
   0x3   :  { %p480_p1 = scmp.lt.u32.totalorder %s476_s28, %s673_s1 }
   0x5   :  { %p482_p2 = pnand %p480_p1, %p477_p0 }
   0x7   :  { %485 = shalt.err (!%p482_p2)
}
   0x8   :  { %s486_s10 = scalar_lea.vmem %s23_s25, 128  ;;  %p491_p4 = scmp.lt.s32.totalorder %s23_s25, %s23_s25 }
   0x9   :  { %p487_p3 = scmp.ne.s32.totalorder %s23_s25, %s486_s10  ;;  %p492_p5 = scmp.lt.s32.totalorder %s486_s10, %s486_s10 }
   0xb   :  { %p493_p6 = por %p492_p5, %p491_p4 }
   0xd   :  { %p494_p7 = pnand %p493_p6, %p487_p3 }
   0xf   :  { %497 = shalt.err (!%p494_p7)
}
  0x10   :  { %25 = dma.hbm_to_vmem [thread:$0]  %s673_s1, 128, %s23_s25, [#allocation3]  }
  0x11   :  { %520 = dma.done.wait [#allocation3], 128  }
  0x12   :  { %521 = vsyncadd [#allocation3], 4294967168  ;;  %v525_v0 = vmov 0.0   ;;  %vm526_vm0 = vmmov 0   ;;  %vm53_vm1 = vcmask 1046528   ;;  %vm49_vm2 = vcmask 56320  }
  0x13   :  { %411 = vmatprep.subr.mxu0 %v525_v0  ;;  %413 = vmatprep.mubr.msk.f32.mxu0 %vm526_vm0, %v525_v0  ;;  %v41_v1 = vld [vmem:[#allocation2] sm:$0x7f]  ;;  %v461_v4 = vld [vmem:[%s675_s3 + $0x8] sm:$0xff]   ;;  %v462_v5 = vld [vmem:[%s675_s3 + $0x10] sm:$0xff]   ;;  %s527_s24 = smov [#allocation5]   ;;  %vm353_vm3 = vcmask 64512  }
  0x14   :  { %416 = vmatprep.subr.bf16.mxu1 %v525_v0  ;;  %432 = vmatprep.mubr.msk.bf16.mxu1 %vm526_vm0, %v525_v0  ;;  %v40_v2 = vld [vmem:[%s672_s0] sm:$0xff]  ;;  %v463_v6 = vld [vmem:[%s675_s3 + $0x18] sm:$0xff]   ;;  %v465_v8 = vld [vmem:[%s675_s3 + $0x28] sm:$0xff]   ;;  %s361_s25 = sshll.u32 %s527_s24, 4  ;;  %s362_s25 = int_to_ptr.vmem [resolvable:$true] %s361_s25 }
  0x15   :  { %412 = vmatpush3.msk.msra.mxu0 %vm53_vm1, %v41_v1  ;;  %v460_v3 = vld [vmem:[%s675_s3] sm:$0xff]   ;;  %v466_v9 = vld [vmem:[%s675_s3 + $0x30] sm:$0xff]   ;;  %v467_v10 = vld [vmem:[%s675_s3 + $0x38] sm:$0xff]   ;;  %p503_p9 = scmp.lt.s32.totalorder %s362_s25, %s362_s25 }
  0x16   :  { %414 = vmatmul.mubr.msk.f32.vlgmr.msra.gmra.mrb[0].mxu0 %vm49_vm2, %v40_v2  ;;  %436 = vmatprep.subr.bf16.mxu0 %v525_v0  ;;  %v464_v7 = vld [vmem:[%s675_s3 + $0x20] sm:$0xff]   ;;  %v469_v12 = vld [vmem:[%s677_s5 + $0x8] sm:$0xff]   ;;  %v470_v13 = vld [vmem:[%s677_s5 + $0x10] sm:$0xff]  }
  0x17   :  { %417 = vmatpush3.bf16.msra.mxu1 %v460_v3  ;;  %452 = vmatprep.mubr.msk.bf16.mxu0 %vm526_vm0, %v525_v0  ;;  %v468_v11 = vld [vmem:[%s677_s5] sm:$0xff]   ;;  %v471_v14 = vld [vmem:[%s677_s5 + $0x18] sm:$0xff]   ;;  %v473_v16 = vld [vmem:[%s677_s5 + $0x28] sm:$0xff]  }
  0x18   :  { %418 = vmatprep.subr.bf16.mxu1 %v525_v0  ;;  %437 = vmatpush3.bf16.msra.mxu0 %v468_v11  ;;  %v472_v15 = vld [vmem:[%s677_s5 + $0x20] sm:$0xff]   ;;  %v474_v23 = vld [vmem:[%s677_s5 + $0x30] sm:$0xff]   ;;  %v475_v24 = vld [vmem:[%s677_s5 + $0x38] sm:$0xff]  }
  0x19   :  { %438 = vmatprep.subr.bf16.mxu0 %v525_v0  ;;  %v370_v17 = vld [vmem:[%s674_s2] ss:$0 sm:$0xff] }
  0x1a   :  { %v373_v25 = vld [vmem:[%s676_s4] ss:$0 sm:$0xff]  ;;  %s498_s4 = scalar_lea.vmem %s362_s25, 128 }
  0x1b   :  { %419 = vmatpush3.bf16.msra.mxu1 %v461_v4  ;;  %v382_v33 = vld [vmem:[%s678_s6] ss:$0 sm:$0xff]  ;;  %p499_p8 = scmp.ne.s32.totalorder %s362_s25, %s498_s4  ;;  %p504_p10 = scmp.lt.s32.totalorder %s498_s4, %s498_s4 }
  0x1c   :  { %420 = vmatprep.subr.bf16.mxu1 %v525_v0  ;;  %439 = vmatpush3.bf16.msra.mxu0 %v469_v12 }
  0x1d   :  { %440 = vmatprep.subr.bf16.mxu0 %v525_v0  ;;  %p505_p11 = por %p504_p10, %p503_p9 }
  0x1f   :  { %421 = vmatpush3.bf16.msra.mxu1 %v462_v5  ;;  %p506_p12 = pnand %p505_p11, %p499_p8 }
  0x20   :  { %422 = vmatprep.subr.bf16.mxu1 %v525_v0  ;;  %441 = vmatpush3.bf16.msra.mxu0 %v470_v13 }
  0x21   :  { %442 = vmatprep.subr.bf16.mxu0 %v525_v0 }
  0x23   :  { %423 = vmatpush3.bf16.msra.mxu1 %v463_v6 }
  0x24   :  { %424 = vmatprep.subr.bf16.mxu1 %v525_v0  ;;  %443 = vmatpush3.bf16.msra.mxu0 %v471_v14 }
  0x25   :  { %444 = vmatprep.subr.bf16.mxu0 %v525_v0 }
  0x27   :  { %425 = vmatpush3.bf16.msra.mxu1 %v464_v7 }
  0x28   :  { %426 = vmatprep.subr.bf16.mxu1 %v525_v0  ;;  %445 = vmatpush3.bf16.msra.mxu0 %v472_v15 }
  0x29   :  { %446 = vmatprep.subr.bf16.mxu0 %v525_v0 }
  0x2b   :  { %427 = vmatpush3.bf16.msra.mxu1 %v465_v8 }
  0x2c   :  { %428 = vmatprep.subr.bf16.mxu1 %v525_v0  ;;  %447 = vmatpush3.bf16.msra.mxu0 %v473_v16 }
  0x2d   :  { %448 = vmatprep.subr.bf16.mxu0 %v525_v0 }
  0x2f   :  { %429 = vmatpush3.bf16.msra.mxu1 %v466_v9 }
  0x30   :  { %430 = vmatprep.subr.bf16.mxu1 %v525_v0  ;;  %449 = vmatpush3.bf16.msra.mxu0 %v474_v23 }
  0x31   :  { %450 = vmatprep.subr.bf16.mxu0 %v525_v0 }
  0x33   :  { %431 = vmatpush3.bf16.msra.mxu1 %v467_v10 }
  0x34   :  { %451 = vmatpush3.bf16.msra.mxu0 %v475_v24 }
  0xe9   :  { %v123_v18 = vpop.f32.mrb[0].mxu0 }
  0xea   :  { %v124_v19 = vadd.f32 %v370_v17, %v123_v18  ;;  %v415_v20 = vpop.f32.mrb[1].mxu0 }
  0xec   :  { %v127_v21 = vmax.f32 %v124_v19, 0.0 }
  0xee   :  { %v128_v22 = vpack.c.bf16 %v127_v21, %v127_v21 }
  0xf0   :  { %433 = vmatmul.mubr.bf16.vlgmr.msra.gmra.mrb[0].mxu1 %v128_v22 }
 0x1c3   :  { %v234_v26 = vpop.f32.mrb[0].mxu1 }
 0x1c4   :  { %v235_v27 = vadd.f32 %v373_v25, %v234_v26  ;;  %v434_v28 = vpop.f32.mrb[1].mxu1 }
 0x1c5   :  { %v237_v29 = vpop.f32.mrb[2].mxu1 }
 0x1c6   :  { %v240_v30 = vmax.f32 %v235_v27, 0.0  ;;  %v435_v31 = vpop.f32.mrb[3].mxu1 }
 0x1c8   :  { %v241_v32 = vpack.c.bf16 %v240_v30, %v240_v30 }
 0x1ca   :  { %453 = vmatmul.mubr.bf16.vlgmr.msra.gmra.mrb[4].mxu0 %v241_v32 }
 0x29d   :  { %v347_v34 = vpop.f32.mrb[4].mxu0 }
 0x29e   :  { %v348_v35 = vadd.f32 %v382_v33, %v347_v34  ;;  %v454_v36 = vpop.f32.mrb[5].mxu0 }
 0x29f   :  { %v350_v37 = vpop.f32.mrb[6].mxu0 }
 0x2a0   :  { %v455_v38 = vpop.f32.mrb[7].mxu0  ;;  %354 = vst.msk [vmem:[#allocation5] sm:$0xff] %vm353_vm3, %v348_v35 }
 0x2a1   :  { %509 = shalt.err (!%p506_p12)
}
 0x2a2   :  { %s510_s6 = scalar_lea.hbm %s679_s7, 128 }
 0x2a3   :  { %p511_p13 = scmp.ne.s32.totalorder %s679_s7, %s510_s6  ;;  %p514_p0 = scmp.lt.u32.totalorder %s510_s6, %s679_s7 }
 0x2a5   :  { %p516_p1 = pnand %p514_p0, %p511_p13 }
 0x2a7   :  { %519 = shalt.err (!%p516_p1)
}
 0x2a8   :  { %364 = dma.vmem_to_hbm [thread:$0]  %s362_s25, 128, %s679_s7, [#allocation4]  }
 0x2a9   :  { %522 = dma.done.wait [#allocation4], 128  }
 0x2aa   :  { %523 = vsyncadd [#allocation4], 4294967168 }
 0x2ab   :  { %368 = vsyncpa [#allocation3], 1 }
 0x2ac   :  { %369 = vsyncpa [#allocation4], 1 }

</bundles_post_ra>
